<compile_context>
chip_gen: v6e
topology: v6e:2x2x1
jax: 0.10.0
libtpu: 0.0.40
codegen_flags: <defaults>
</compile_context>

<pallas_src>
import math

import jax
import jax.numpy as jnp
from jax.experimental import pallas as pl
from jax.experimental.pallas import tpu as pltpu


# ----------------------------- config (small) -----------------------------
B = 2            # batch
S = 8            # sequence length
H = 32           # hidden size
NH = 4           # num attention heads
HD = H // NH     # head dim
SCALE = 1.0 / math.sqrt(HD)


# ------------------------------- kernel -----------------------------------
def social_attention_kernel(
    x_ref,       # (B*NH, S, H)      VMEM  hidden states, replicated per head
    wqkv_ref,    # (B*NH, H, 3*HD)   VMEM  per-head fused / pre-transposed / pre-scaled QKV weight
    bqkv_ref,    # (B*NH, 1, 3*HD)   VMEM  per-head fused QKV bias (Q part pre-scaled)
    wo_ref,      # (B*NH, HD, H)     VMEM  per-head row blocks of the pre-transposed output weight
    bo_ref,      # (1, 1, H)         VMEM  output bias
    bias_ref,    # (B*NH, S)         VMEM  combined additive bias over key positions
    out_ref,     # (B, S, H)         VMEM  attention output
    probs_ref,   # (B*NH, S, S)      VMEM  attention probabilities
):
    # Fused per-(batch*head) QKV projection: one leading-batch batched matmul,
    # weights already transposed and 1/sqrt(HD) already folded into the Q columns.
    qkv = jnp.einsum("bsh,bhf->bsf", x_ref[...], wqkv_ref[...],
                     preferred_element_type=jnp.float32) + bqkv_ref[...]   # (B*NH, S, 3*HD)
    q = qkv[..., 0:HD]
    k = qkv[..., HD:2 * HD]
    v = qkv[..., 2 * HD:3 * HD]

    # All heads' attention scores in one batched matmul (the single implicit K relayout
    # happens once here, not per head).
    scores = jnp.einsum("bqd,bkd->bqk", q, k,
                        preferred_element_type=jnp.float32)                # (B*NH, S, S)
    # combined social-token biases + additive attention mask (per key position)
    scores = scores + bias_ref[...][:, None, :]

    # One softmax over the whole tensor; exact divide keeps probability rows normalized.
    m = jnp.max(scores, axis=-1, keepdims=True)
    e = jnp.exp(scores - m)
    p = e / jnp.sum(e, axis=-1, keepdims=True)                             # (B*NH, S, S)
    probs_ref[...] = p
    # dropout: eval-mode identity (deterministic kernel)

    # One batched context matmul ...
    ctx = jnp.einsum("bqk,bkd->bqd", p, v,
                     preferred_element_type=jnp.float32)                   # (B*NH, S, HD)
    # ... then per-head output-projection partials summed over heads (replaces the
    # (B, NH, S, HD) -> (B, S, H) transpose with a cheap major-axis reduction).
    partial = jnp.einsum("bqd,bdh->bqh", ctx, wo_ref[...],
                         preferred_element_type=jnp.float32)               # (B*NH, S, H)
    out = jnp.sum(partial.reshape(B, NH, S, H), axis=1) + bo_ref[...]      # (B, S, H)
    out_ref[...] = out.astype(out_ref.dtype)


# ------------------------------- wrapper -----------------------------------
def fuse_params(params):
    """One-time operand preparation, hoisted out of the per-call path (review item)."""
    wq, bq, wk, bk, wv, bv, wo, bo, hbias, mbias, ebias = params

    def per_head(w_t):                      # (H, H) with head-major columns -> (NH, H, HD)
        return jnp.transpose(w_t.reshape(H, NH, HD), (1, 0, 2))

    # y = x @ W^T + b, fused per head as [Q | K | V]; 1/sqrt(HD) folded into Q weight/bias.
    wqkv = jnp.concatenate([per_head(wq.T * SCALE), per_head(wk.T), per_head(wv.T)], axis=2)
    bqkv = jnp.concatenate([(bq * SCALE).reshape(NH, 1, HD),
                            bk.reshape(NH, 1, HD),
                            bv.reshape(NH, 1, HD)], axis=2)
    wqkv_rep = jnp.tile(wqkv, (B, 1, 1))                      # (B*NH, H, 3*HD)
    bqkv_rep = jnp.tile(bqkv, (B, 1, 1))                      # (B*NH, 1, 3*HD)
    wo_rep = jnp.tile(wo.T.reshape(NH, HD, H), (B, 1, 1))     # (B*NH, HD, H)
    bo3 = bo.reshape(1, 1, H)
    return (wqkv_rep, bqkv_rep, wo_rep, bo3,
            hbias.reshape(NH), mbias.reshape(NH), ebias.reshape(NH))


@jax.jit
def social_attention(x, fused_params, hashtag_mask, mention_mask, emoji_mask, attention_mask):
    """x: (B, S, H) f32; masks: (B, S) f32; attention_mask: (B, 1, 1, S) additive f32."""
    wqkv_rep, bqkv_rep, wo_rep, bo3, hb, mb, eb = fused_params

    # Combined per-(batch, head, key-position) additive bias:
    #   hb[h]*hmask[b,k] + mb[h]*mmask[b,k] + eb[h]*emask[b,k] + attn_mask[b,k]
    bias = (hb[None, :, None] * hashtag_mask[:, None, :]
            + mb[None, :, None] * mention_mask[:, None, :]
            + eb[None, :, None] * emoji_mask[:, None, :]
            + attention_mask.reshape(B, 1, S))                # (B, NH, S)
    bias2d = bias.reshape(B * NH, S)

    # Hidden states replicated per head -> leading-batch layout for the kernel.
    x_rep = jnp.broadcast_to(x[:, None], (B, NH, S, H)).reshape(B * NH, S, H)

    vmem = pl.BlockSpec(memory_space=pltpu.MemorySpace.VMEM)
    out3, probs3 = pl.pallas_call(
        social_attention_kernel,
        out_shape=(
            jax.ShapeDtypeStruct((B, S, H), jnp.float32),
            jax.ShapeDtypeStruct((B * NH, S, S), jnp.float32),
        ),
        in_specs=[vmem] * 6,
        out_specs=(
            pl.BlockSpec(memory_space=pltpu.MemorySpace.VMEM),
            pl.BlockSpec(memory_space=pltpu.MemorySpace.VMEM),
        ),
    )(x_rep, wqkv_rep, bqkv_rep, wo_rep, bo3, bias2d)

    return out3, probs3.reshape(B, NH, S, S)


# ----------------------------- reference (pure JAX) -------------------------
def social_attention_ref(x, params, hmask, mmask, emask, amask):
    wq, bq, wk, bk, wv, bv, wo, bo, hbias, mbias, ebias = params

    def split_heads(t):  # (B, S, H) -> (B, NH, S, HD)
        return t.reshape(B, S, NH, HD).transpose(0, 2, 1, 3)

    q = split_heads(x @ wq.T + bq)
    k = split_heads(x @ wk.T + bk)
    v = split_heads(x @ wv.T + bv)
    scores = jnp.einsum("bhqd,bhkd->bhqk", q, k) * SCALE
    scores = scores + hbias * hmask[:, None, None, :]
    scores = scores + mbias * mmask[:, None, None, :]
    scores = scores + ebias * emask[:, None, None, :]
    scores = scores + amask
    probs = jax.nn.softmax(scores, axis=-1)
    ctx = jnp.einsum("bhqk,bhkd->bhqd", probs, v)
    ctx = ctx.transpose(0, 2, 1, 3).reshape(B, S, H)
    out = ctx @ wo.T + bo
    return out, probs


# --------------------------------- main -------------------------------------
if __name__ == "__main__":
    key = jax.random.PRNGKey(0)
    keys = jax.random.split(key, 16)

    x = jax.random.normal(keys[0], (B, S, H), dtype=jnp.float32)

    def lin_w(k):
        return jax.random.normal(k, (H, H), dtype=jnp.float32) * (1.0 / math.sqrt(H))

    wq, wk, wv, wo = lin_w(keys[1]), lin_w(keys[2]), lin_w(keys[3]), lin_w(keys[4])
    bq = jax.random.normal(keys[5], (H,), dtype=jnp.float32) * 0.01
    bk = jax.random.normal(keys[6], (H,), dtype=jnp.float32) * 0.01
    bv = jax.random.normal(keys[7], (H,), dtype=jnp.float32) * 0.01
    bo = jax.random.normal(keys[8], (H,), dtype=jnp.float32) * 0.01
    # nn.Parameter(torch.zeros(1, NH, 1, 1)) in the module; use small nonzero values here so
    # the social-bias path is exercised (still deterministic).
    hbias = jax.random.normal(keys[9], (1, NH, 1, 1), dtype=jnp.float32) * 0.1
    mbias = jax.random.normal(keys[10], (1, NH, 1, 1), dtype=jnp.float32) * 0.1
    ebias = jax.random.normal(keys[11], (1, NH, 1, 1), dtype=jnp.float32) * 0.1

    params = (wq, bq, wk, bk, wv, bv, wo, bo, hbias, mbias, ebias)

    hashtag_mask = (jax.random.uniform(keys[12], (B, S)) > 0.7).astype(jnp.float32)
    mention_mask = (jax.random.uniform(keys[13], (B, S)) > 0.8).astype(jnp.float32)
    emoji_mask = (jax.random.uniform(keys[14], (B, S)) > 0.8).astype(jnp.float32)
    # additive attention mask (0 for valid, -1e9 for padded), shape (B, 1, 1, S)
    valid = (jax.random.uniform(keys[15], (B, S)) > 0.2).astype(jnp.float32)
    attention_mask = ((1.0 - valid) * -1e9).reshape(B, 1, 1, S)

    # Weight fusion / transposition / scale-fold done ONCE (reused across calls).
    fused_params = fuse_params(params)

    out, probs = social_attention(
        x, fused_params, hashtag_mask, mention_mask, emoji_mask, attention_mask
    )
    jax.block_until_ready((out, probs))

    out_exp, probs_exp = social_attention_ref(
        x, params, hashtag_mask, mention_mask, emoji_mask, attention_mask
    )
    # Softmax is exact in the kernel now (no approx reciprocal); the remaining slack only
    # covers MXU vs XLA matmul rounding differences on hardware.
    assert jnp.allclose(out, out_exp, atol=2e-3, rtol=2e-3), "output mismatch"
    assert jnp.allclose(probs, probs_exp, atol=2e-3, rtol=2e-3), "probs mismatch"

    print("KERNEL_OK")
</pallas_src>

<mosaic_0001>
module attributes {stable_mosaic.version = 11 : i64} {
  func.func @social_attention_kernel(%arg0: memref<8x8x32xf32, #tpu.memory_space<vmem>>, %arg1: memref<8x32x24xf32, #tpu.memory_space<vmem>>, %arg2: memref<8x1x24xf32, #tpu.memory_space<vmem>>, %arg3: memref<8x8x32xf32, #tpu.memory_space<vmem>>, %arg4: memref<1x1x32xf32, #tpu.memory_space<vmem>>, %arg5: memref<8x8xf32, #tpu.memory_space<vmem>>, %arg6: memref<2x8x32xf32, #tpu.memory_space<vmem>>, %arg7: memref<8x8x8xf32, #tpu.memory_space<vmem>>) attributes {dimension_semantics = [], scalar_prefetch = 0 : i64, scratch_operands = 0 : i64, tpu.core_type = #tpu.core_type<tc>} {
    %c0 = arith.constant 0 : index
    %c0_0 = arith.constant 0 : index
    %c0_1 = arith.constant 0 : index
    %0 = vector.load %arg0[%c0, %c0_0, %c0_1] : memref<8x8x32xf32, #tpu.memory_space<vmem>>, vector<8x8x32xf32>
    %c0_2 = arith.constant 0 : index
    %c0_3 = arith.constant 0 : index
    %c0_4 = arith.constant 0 : index
    %1 = vector.load %arg1[%c0_2, %c0_3, %c0_4] : memref<8x32x24xf32, #tpu.memory_space<vmem>>, vector<8x32x24xf32>
    "tpu.trace_start"() <{level = 10 : i32, message = "bsh,bhf->bsf"}> : () -> ()
    %cst = arith.constant dense<0.000000e+00> : vector<8x8x24xf32>
    %2 = tpu.matmul %0, %1, %cst {dimension_numbers = #tpu.dot_dimension_numbers<[2], [1], [1], [2], [0, 0, 0, 1, 1, 2], [0], [0]>} : vector<8x8x32xf32>, vector<8x32x24xf32>, vector<8x8x24xf32> -> vector<8x8x24xf32>
    "tpu.trace_stop"() : () -> ()
    %c0_5 = arith.constant 0 : index
    %c0_6 = arith.constant 0 : index
    %c0_7 = arith.constant 0 : index
    %3 = vector.load %arg2[%c0_5, %c0_6, %c0_7] : memref<8x1x24xf32, #tpu.memory_space<vmem>>, vector<8x1x24xf32>
    %4 = vector.broadcast %3 : vector<8x1x24xf32> to vector<8x8x24xf32>
    %5 = arith.addf %2, %4 : vector<8x8x24xf32>
    %6 = vector.extract_strided_slice %5 {offsets = [0, 0, 0], sizes = [8, 8, 8], strides = [1, 1, 1]} : vector<8x8x24xf32> to vector<8x8x8xf32>
    %7 = vector.extract_strided_slice %5 {offsets = [0, 0, 8], sizes = [8, 8, 8], strides = [1, 1, 1]} : vector<8x8x24xf32> to vector<8x8x8xf32>
    %8 = vector.extract_strided_slice %5 {offsets = [0, 0, 16], sizes = [8, 8, 8], strides = [1, 1, 1]} : vector<8x8x24xf32> to vector<8x8x8xf32>
    "tpu.trace_start"() <{level = 10 : i32, message = "bqd,bkd->bqk"}> : () -> ()
    %cst_8 = arith.constant dense<0.000000e+00> : vector<8x8x8xf32>
    %9 = tpu.matmul %6, %7, %cst_8 {dimension_numbers = #tpu.dot_dimension_numbers<[2], [2], [1], [1], [0, 0, 0, 1, 1, 1], [0], [0]>} : vector<8x8x8xf32>, vector<8x8x8xf32>, vector<8x8x8xf32> -> vector<8x8x8xf32>
    "tpu.trace_stop"() : () -> ()
    %c0_9 = arith.constant 0 : index
    %c0_10 = arith.constant 0 : index
    %10 = vector.load %arg5[%c0_9, %c0_10] : memref<8x8xf32, #tpu.memory_space<vmem>>, vector<8x8xf32>
    %11 = vector.shape_cast %10 : vector<8x8xf32> to vector<8x1x8xf32>
    %12 = vector.broadcast %11 : vector<8x1x8xf32> to vector<8x8x8xf32>
    %13 = arith.addf %9, %12 : vector<8x8x8xf32>
    %cst_11 = arith.constant dense<0xFF800000> : vector<8x8xf32>
    %14 = vector.multi_reduction <maximumf>, %13, %cst_11 [2] : vector<8x8x8xf32> to vector<8x8xf32>
    %15 = vector.shape_cast %14 : vector<8x8xf32> to vector<8x8x1xf32>
    %16 = vector.broadcast %15 : vector<8x8x1xf32> to vector<8x8x8xf32>
    %17 = arith.subf %13, %16 : vector<8x8x8xf32>
    %18 = math.exp %17 : vector<8x8x8xf32>
    %cst_12 = arith.constant dense<0.000000e+00> : vector<8x8xf32>
    %19 = vector.multi_reduction <add>, %18, %cst_12 [2] : vector<8x8x8xf32> to vector<8x8xf32>
    %20 = vector.shape_cast %19 : vector<8x8xf32> to vector<8x8x1xf32>
    %21 = vector.broadcast %20 : vector<8x8x1xf32> to vector<8x8x8xf32>
    %22 = arith.divf %18, %21 : vector<8x8x8xf32>
    %c0_13 = arith.constant 0 : index
    %c0_14 = arith.constant 0 : index
    %c0_15 = arith.constant 0 : index
    %23 = vector.load %arg7[%c0_13, %c0_14, %c0_15] : memref<8x8x8xf32, #tpu.memory_space<vmem>>, vector<8x8x8xf32>
    tpu.vector_store %arg7[%c0_13, %c0_14, %c0_15], %22 {strides = array<i32>} : memref<8x8x8xf32, #tpu.memory_space<vmem>>, vector<8x8x8xf32>,
    "tpu.trace_start"() <{level = 10 : i32, message = "bqk,bkd->bqd"}> : () -> ()
    %cst_16 = arith.constant dense<0.000000e+00> : vector<8x8x8xf32>
    %24 = tpu.matmul %22, %8, %cst_16 {dimension_numbers = #tpu.dot_dimension_numbers<[2], [1], [1], [2], [0, 0, 0, 1, 1, 2], [0], [0]>} : vector<8x8x8xf32>, vector<8x8x8xf32>, vector<8x8x8xf32> -> vector<8x8x8xf32>
    "tpu.trace_stop"() : () -> ()
    %c0_17 = arith.constant 0 : index
    %c0_18 = arith.constant 0 : index
    %c0_19 = arith.constant 0 : index
    %25 = vector.load %arg3[%c0_17, %c0_18, %c0_19] : memref<8x8x32xf32, #tpu.memory_space<vmem>>, vector<8x8x32xf32>
    "tpu.trace_start"() <{level = 10 : i32, message = "bqd,bdh->bqh"}> : () -> ()
    %cst_20 = arith.constant dense<0.000000e+00> : vector<8x8x32xf32>
    %26 = tpu.matmul %24, %25, %cst_20 {dimension_numbers = #tpu.dot_dimension_numbers<[2], [1], [1], [2], [0, 0, 0, 1, 1, 2], [0], [0]>} : vector<8x8x8xf32>, vector<8x8x32xf32>, vector<8x8x32xf32> -> vector<8x8x32xf32>
    "tpu.trace_stop"() : () -> ()
    %27 = vector.shape_cast %26 : vector<8x8x32xf32> to vector<2x4x8x32xf32>
    %cst_21 = arith.constant dense<0.000000e+00> : vector<2x8x32xf32>
    %28 = vector.multi_reduction <add>, %27, %cst_21 [1] : vector<2x4x8x32xf32> to vector<2x8x32xf32>
    %c0_22 = arith.constant 0 : index
    %c0_23 = arith.constant 0 : index
    %c0_24 = arith.constant 0 : index
    %29 = vector.load %arg4[%c0_22, %c0_23, %c0_24] : memref<1x1x32xf32, #tpu.memory_space<vmem>>, vector<1x1x32xf32>
    %30 = vector.broadcast %29 : vector<1x1x32xf32> to vector<2x8x32xf32>
    %31 = arith.addf %28, %30 : vector<2x8x32xf32>
    %c0_25 = arith.constant 0 : index
    %c0_26 = arith.constant 0 : index
    %c0_27 = arith.constant 0 : index
    %32 = vector.load %arg6[%c0_25, %c0_26, %c0_27] : memref<2x8x32xf32, #tpu.memory_space<vmem>>, vector<2x8x32xf32>
    tpu.vector_store %arg6[%c0_25, %c0_26, %c0_27], %31 {strides = array<i32>} : memref<2x8x32xf32, #tpu.memory_space<vmem>>, vector<2x8x32xf32>,
    return
  }
}

</mosaic_0001>

<bundles_post_ra>
// kernel: social_attention.1
= control target key start
LH: loop header
LB: loop body
LE: loop exit
PB: predicated region body
PF: predicated region fallthrough
CT: control target
= control target key end

     0   :  { %13 = vsyncpa [#allocation3], 0  ;;  %v3200_v2 = vmov 0.0   ;;  %vm123_vm0 = vcmask 261120   ;;  %vm3201_vm1 = vmmov 0   ;;  %s3713_s0 = inlined_call_operand.vmem [shape: f32[8,8,32], index: 0, kind: input, shape index: {}]   ;;  %s3714_s1 = inlined_call_operand.vmem [shape: f32[8,32,24], index: 1, kind: input, shape index: {}]   ;;  %s3715_s2 = inlined_call_operand.vmem [shape: f32[8,1,24], index: 2, kind: input, shape index: {}]   ;;  %s3716_s3 = inlined_call_operand.vmem [shape: f32[8,8,32], index: 3, kind: input, shape index: {}]   ;;  %s3717_s4 = inlined_call_operand.vmem [shape: f32[1,1,32], index: 4, kind: input, shape index: {}]   ;;  %s3718_s5 = inlined_call_operand.vmem [shape: f32[8,8], index: 5, kind: input, shape index: {}]   ;;  %s3719_s6 = inlined_call_operand.hbm [shape: f32[2,8,32], index: 6, kind: output, shape index: {0}]   ;;  %s3720_s7 = inlined_call_operand.hbm [shape: f32[8,8,8], index: 7, kind: output, shape index: {1}]  }
   0x1   :  { %v38_v0 = vld [vmem:[%s3714_s1 + $0x18] sm:$0xff]  ;;  %2906 = vmatprep.subr.mxu0 %v3200_v2  ;;  %2917 = vmatprep.subr.mxu1 %v3200_v2  ;;  %v37_v3 = vld [vmem:[%s3714_s1 + $0x10] sm:$0xff]  ;;  %v36_v5 = vld [vmem:[%s3714_s1 + $0x8] sm:$0xff] }
   0x2   :  { %v42_v1 = vld [vmem:[%s3714_s1 + $0x38] sm:$0xff]  ;;  %v41_v4 = vld [vmem:[%s3714_s1 + $0x30] sm:$0xff]  ;;  %2907 = vmatpush3.msra.mxu0 %v38_v0  ;;  %v40_v6 = vld [vmem:[%s3714_s1 + $0x28] sm:$0xff]  ;;  %2914 = vmatprep.mubr.msk.f32.mxu0 %vm3201_vm1, %v3200_v2 }
   0x3   :  { %2918 = vmatpush3.msra.mxu1 %v42_v1  ;;  %2908 = vmatprep.subr.mxu0 %v3200_v2  ;;  %v35_v7 = vld [vmem:[%s3714_s1] sm:$0xff]  ;;  %v28_v10 = vld [vmem:[%s3713_s0 + $0x8] sm:$0xff]  ;;  %v46_v11 = vld [vmem:[%s3714_s1 + $0x58] sm:$0xff] }
   0x4   :  { %2919 = vmatprep.subr.mxu1 %v3200_v2  ;;  %2909 = vmatpush3.msra.mxu0 %v37_v3  ;;  %v39_v8 = vld [vmem:[%s3714_s1 + $0x20] sm:$0xff]  ;;  %v50_v12 = vld [vmem:[%s3714_s1 + $0x78] sm:$0xff]  ;;  %v45_v13 = vld [vmem:[%s3714_s1 + $0x50] sm:$0xff] }
   0x5   :  { %2920 = vmatpush3.msra.mxu1 %v41_v4  ;;  %2910 = vmatprep.subr.mxu0 %v3200_v2  ;;  %v27_v9 = vld [vmem:[%s3713_s0] sm:$0xff]  ;;  %v49_v14 = vld [vmem:[%s3714_s1 + $0x70] sm:$0xff]  ;;  %v44_v15 = vld [vmem:[%s3714_s1 + $0x48] sm:$0xff] }
   0x6   :  { %2921 = vmatprep.subr.mxu1 %v3200_v2  ;;  %2911 = vmatpush3.msra.mxu0 %v36_v5  ;;  %v48_v16 = vld [vmem:[%s3714_s1 + $0x68] sm:$0xff] }
   0x7   :  { %2922 = vmatpush3.msra.mxu1 %v40_v6  ;;  %2912 = vmatprep.subr.mxu0 %v3200_v2 }
   0x8   :  { %2923 = vmatprep.subr.mxu1 %v3200_v2  ;;  %2913 = vmatpush3.msra.mxu0 %v35_v7 }
   0x9   :  { %2924 = vmatpush3.msra.mxu1 %v39_v8  ;;  %2915 = vmatmul.mubr.msk.f32.vlgmr.msra.gmra.mxu0 %vm123_vm0, %v27_v9 }
   0xa   :  { %2925 = vmatprep.mubr.msk.f32.mxu1 %vm3201_vm1, %v3200_v2  ;;  %2928 = vmatprep.subr.mxu0 %v3200_v2 }
   0xb   :  { %2939 = vmatprep.subr.mxu1 %v3200_v2  ;;  %2926 = vmatmul.mubr.msk.f32.vlgmr.msra.gmra.mxu1 %vm123_vm0, %v28_v10 }
   0xc   :  { %2929 = vmatpush3.msra.mxu0 %v46_v11  ;;  %2940 = vmatpush3.msra.mxu1 %v50_v12 }
   0xd   :  { %2930 = vmatprep.subr.mxu0 %v3200_v2  ;;  %2941 = vmatprep.subr.mxu1 %v3200_v2 }
   0xe   :  { %14 = vsyncpa [#allocation5], 0  ;;  %2931 = vmatpush3.msra.mxu0 %v45_v13  ;;  %2942 = vmatpush3.msra.mxu1 %v49_v14  ;;  %v43_v17 = vld [vmem:[%s3714_s1 + $0x40] sm:$0xff]  ;;  %v29_v19 = vld [vmem:[%s3713_s0 + $0x10] sm:$0xff]  ;;  %s3202_s14 = smov 120   ;;  %vm802_vm2 = vcmask 64512  }
   0xf   :  { %2932 = vmatprep.subr.mxu0 %v3200_v2  ;;  %2943 = vmatprep.subr.mxu1 %v3200_v2  ;;  %v47_v18 = vld [vmem:[%s3714_s1 + $0x60] sm:$0xff]  ;;  %v30_v20 = vld [vmem:[%s3713_s0 + $0x18] sm:$0xff]  ;;  %v53_v23 = vld [vmem:[%s3714_s1 + $0x90] sm:$0xff] }
  0x10   :  { %2933 = vmatpush3.msra.mxu0 %v44_v15  ;;  %2944 = vmatpush3.msra.mxu1 %v48_v16  ;;  %v54_v21 = vld [vmem:[%s3714_s1 + $0x98] sm:$0xff]  ;;  %v57_v24 = vld [vmem:[%s3714_s1 + $0xb0] sm:$0xff]  ;;  %v52_v25 = vld [vmem:[%s3714_s1 + $0x88] sm:$0xff] }
  0x11   :  { %2934 = vmatprep.subr.mxu0 %v3200_v2  ;;  %2945 = vmatprep.subr.mxu1 %v3200_v2  ;;  %v58_v22 = vld [vmem:[%s3714_s1 + $0xb8] sm:$0xff]  ;;  %v56_v26 = vld [vmem:[%s3714_s1 + $0xa8] sm:$0xff]  ;;  %v51_v27 = vld [vmem:[%s3714_s1 + $0x80] sm:$0xff] }
  0x12   :  { %2935 = vmatpush3.msra.mxu0 %v43_v17  ;;  %2936 = vmatprep.mubr.msk.f32.mxu0 %vm3201_vm1, %v3200_v2  ;;  %v55_v28 = vld [vmem:[%s3714_s1 + $0xa0] sm:$0xff]  ;;  %v32_v30 = vld [vmem:[%s3713_s0 + $0x28] sm:$0xff]  ;;  %v62_v31 = vld [vmem:[%s3714_s1 + $0xd8] sm:$0xff] }
  0x13   :  { %2946 = vmatpush3.msra.mxu1 %v47_v18  ;;  %2937 = vmatmul.mubr.msk.f32.vlgmr.msra.gmra.mxu0 %vm123_vm0, %v29_v19  ;;  %v31_v29 = vld [vmem:[%s3713_s0 + $0x20] sm:$0xff]  ;;  %v66_v32 = vld [vmem:[%s3714_s1 + $0xf8] sm:$0xff]  ;;  %v61_v33 = vld [vmem:[%s3714_s1 + $0xd0] sm:$0xff]  ;;  %v3203_v18 = vmov 1966171168  }
  0x14   :  { %2947 = vmatprep.mubr.msk.f32.mxu1 %vm3201_vm1, %v3200_v2  ;;  %2950 = vmatprep.subr.mxu0 %v3200_v2  ;;  %v65_v34 = vld [vmem:[%s3714_s1 + $0xf0] sm:$0xff]  ;;  %v60_v35 = vld [vmem:[%s3714_s1 + $0xc8] sm:$0xff]  ;;  %v59_v37 = vld [vmem:[%s3714_s1 + $0xc0] sm:$0xff]  ;;  %v712_v19 = vunpack.c.l.s4 %v3203_v18 }
  0x15   :  { %2961 = vmatprep.subr.mxu1 %v3200_v2  ;;  %2948 = vmatmul.mubr.msk.f32.vlgmr.msra.gmra.mxu1 %vm123_vm0, %v30_v20  ;;  %v64_v36 = vld [vmem:[%s3714_s1 + $0xe8] sm:$0xff]  ;;  %v63_v38 = vld [vmem:[%s3714_s1 + $0xe0] sm:$0xff]  ;;  %v33_v39 = vld [vmem:[%s3713_s0 + $0x30] sm:$0xff]  ;;  %v714_v20 = vlaneseq }
  0x16   :  { %2951 = vmatpush3.msra.mxu0 %v54_v21  ;;  %2962 = vmatpush3.msra.mxu1 %v58_v22  ;;  %v34_v40 = vld [vmem:[%s3713_s0 + $0x38] sm:$0xff]  ;;  %v2769_v41 = vld [vmem:[%s3715_s2] ss:$0 sm:$0xff]  ;;  %v2770_v43 = vld [vmem:[%s3715_s2 + $0x1] ss:$0 sm:$0xff]  ;;  %v713_v21 = vunpack.c.0.s8 %v712_v19 }
  0x17   :  { %2952 = vmatprep.subr.mxu0 %v3200_v2  ;;  %2963 = vmatprep.subr.mxu1 %v3200_v2  ;;  %v2771_v49 = vld [vmem:[%s3715_s2 + $0x2] ss:$0 sm:$0xff]  ;;  %v2772_v51 = vld [vmem:[%s3715_s2 + $0x3] ss:$0 sm:$0xff]  ;;  %v2773_v57 = vld [vmem:[%s3715_s2 + $0x4] ss:$0 sm:$0xff] }
  0x18   :  { %2953 = vmatpush3.msra.mxu0 %v53_v23  ;;  %2964 = vmatpush3.msra.mxu1 %v57_v24  ;;  %v2774_v58 = vld [vmem:[%s3715_s2 + $0x5] ss:$0 sm:$0xff]  ;;  %v2775_v1 = vld [vmem:[%s3715_s2 + $0x6] ss:$0 sm:$0xff]  ;;  %v2776_v3 = vld [vmem:[%s3715_s2 + $0x7] ss:$0 sm:$0xff] }
  0x19   :  { %2954 = vmatprep.subr.mxu0 %v3200_v2  ;;  %2965 = vmatprep.subr.mxu1 %v3200_v2  ;;  %v715_v22 = vshrl.u32 %v714_v20, 7  ;;  %v708_v24 = vld [vmem:[%s3718_s5] sm:$0xff]  ;;  %s3204_s5 = smov 112  }
  0x1a   :  { %2955 = vmatpush3.msra.mxu0 %v52_v25  ;;  %2966 = vmatpush3.msra.mxu1 %v56_v26 }
  0x1b   :  { %2956 = vmatprep.subr.mxu0 %v3200_v2  ;;  %2967 = vmatprep.subr.mxu1 %v3200_v2  ;;  %v716_v23 = vsub.s32 %v713_v21, %v715_v22 }
  0x1c   :  { %2957 = vmatpush3.msra.mxu0 %v51_v27  ;;  %2958 = vmatprep.mubr.msk.f32.mxu0 %vm3201_vm1, %v3200_v2  ;;  %v761_v27 = vsub.s32 0, %v715_v22 }
  0x1d   :  { %2968 = vmatpush3.msra.mxu1 %v55_v28  ;;  %2969 = vmatprep.mubr.msk.f32.mxu1 %vm3201_vm1, %v3200_v2  ;;  %v717_v25 = vrot.slane %v708_v24, %v716_v23 }
  0x1e   :  { %2959 = vmatmul.mubr.msk.f32.vlgmr.msra.gmra.mxu0 %vm123_vm0, %v31_v29  ;;  %2970 = vmatmul.mubr.msk.f32.vlgmr.msra.gmra.mxu1 %vm123_vm0, %v32_v30 }
  0x1f   :  { %2972 = vmatprep.subr.mxu0 %v3200_v2  ;;  %2983 = vmatprep.subr.mxu1 %v3200_v2  ;;  %v733_v26 = vrot.slane %v717_v25, %v716_v23  ;;  %v725_v28 = vcombine.high %v717_v25, %v717_v25 }
  0x20   :  { %2973 = vmatpush3.msra.mxu0 %v62_v31  ;;  %2984 = vmatpush3.msra.mxu1 %v66_v32 }
  0x21   :  { %2974 = vmatprep.subr.mxu0 %v3200_v2  ;;  %2985 = vmatprep.subr.mxu1 %v3200_v2  ;;  %v762_v29 = vrot.slane %v733_v26, %v761_v27  ;;  %v747_v30 = vrot.slane %v725_v28, %v716_v23 }
  0x22   :  { %2975 = vmatpush3.msra.mxu0 %v61_v33  ;;  %2986 = vmatpush3.msra.mxu1 %v65_v34  ;;  %v710_v34 = vcombine.high %v708_v24, %v708_v24 }
  0x23   :  { %2976 = vmatprep.subr.mxu0 %v3200_v2  ;;  %2987 = vmatprep.subr.mxu1 %v3200_v2  ;;  %v766_v33 = vrot.slane %v747_v30, %v761_v27 }
  0x24   :  { %2977 = vmatpush3.msra.mxu0 %v60_v35  ;;  %2988 = vmatpush3.msra.mxu1 %v64_v36 }
  0x25   :  { %2978 = vmatprep.subr.mxu0 %v3200_v2  ;;  %2989 = vmatprep.subr.mxu1 %v3200_v2 }
  0x26   :  { %2979 = vmatpush3.msra.mxu0 %v59_v37  ;;  %2980 = vmatprep.mubr.msk.f32.mxu0 %vm3201_vm1, %v3200_v2  ;;  %v755_v37 = vcombine.high %v733_v26, %v733_v26 }
  0x27   :  { %2990 = vmatpush3.msra.mxu1 %v63_v38  ;;  %2991 = vmatprep.mubr.msk.f32.mxu1 %vm3201_vm1, %v3200_v2 }
  0x28   :  { %2981 = vmatmul.mubr.msk.f32.vlgmr.msra.gmra.mxu0 %vm123_vm0, %v33_v39  ;;  %2992 = vmatmul.mubr.msk.f32.vlgmr.msra.gmra.mxu1 %vm123_vm0, %v34_v40 }
  0x29   :  { %2994 = vmatprep.subr.mxu0 %v3200_v2  ;;  %2996 = vmatprep.mubr.msk.f32.mxu0 %vm3201_vm1, %v3200_v2 }
  0x2a   :  { %2999 = vmatprep.subr.mxu1 %v3200_v2  ;;  %3001 = vmatprep.mubr.msk.f32.mxu1 %vm3201_vm1, %v3200_v2 }
  0xc9   :  { %v193_v42 = vpop.f32.mrf.mxu0 }
  0xca   :  { %v3437_v44 = vadd.f32 %v2769_v41, %v193_v42  ;;  %v724_v41 = vrot.slane %v710_v34, %v716_v23 }
  0xcb   :  { %v266_v45 = vpop.f32.mrf.mxu1  ;;  %v2916_v46 = vpop.f32.mrf.mxu0 }
  0xcc   :  { %v3439_v47 = vadd.f32 %v2770_v43, %v266_v45  ;;  %800 = vrot.lane.b32.xlu0 %v3437_v44, %s3202_s14  ;;  %v770_v43 = vrot.slane %v755_v37, %v761_v27  ;;  %v757_v45 = vcombine.high %v747_v30, %v747_v30 }
  0xcd   :  { %v2927_v48 = vpop.f32.mrf.mxu1 }
  0xce   :  { %v726_v48 = vcombine.high %v724_v41, %v724_v41 }
  0xd0   :  { %878 = vrot.lane.b32.xlu0 %v3439_v47, %s3202_s14 }
  0xd3   :  { %v339_v50 = vpop.f32.mrf.mxu0 }
  0xd4   :  { %v3451_v52 = vadd.f32 %v2771_v49, %v339_v50  ;;  %v774_v50 = vrot.slane %v757_v45, %v761_v27 }
  0xd5   :  { %v412_v53 = vpop.f32.mrf.mxu1  ;;  %v2938_v54 = vpop.f32.mrf.mxu0 }
  0xd6   :  { %v3453_v55 = vadd.f32 %v2772_v51, %v412_v53  ;;  %955 = vrot.lane.b32.xlu1 %v3451_v52, %s3202_s14 }
  0xd7   :  { %v2949_v56 = vpop.f32.mrf.mxu1 }
  0xd8   :  { %v754_v56 = vrot.slane %v726_v48, %v716_v23 }
  0xda   :  { %1032 = vrot.lane.b32.xlu1 %v3453_v55, %s3202_s14 }
  0xde   :  { %v485_v59 = vpop.f32.mrf.mxu0  ;;  %v558_v60 = vpop.f32.mrf.mxu1 }
  0xdf   :  { %v3465_v61 = vadd.f32 %v2773_v57, %v485_v59  ;;  %v3467_v62 = vadd.f32 %v2774_v58, %v558_v60  ;;  %v740_v57 = vrot.slane %v724_v41, %v716_v23 }
  0xe0   :  { %v2960_v63 = vpop.f32.mrf.mxu0  ;;  %v2971_v0 = vpop.f32.mrf.mxu1 }
  0xe1   :  { %1186 = vrot.lane.b32.xlu1 %v3467_v62, %s3202_s14  ;;  %1109 = vrot.lane.b32.xlu0 %v3465_v61, %s3202_s14  ;;  %v782_v63 = vrot.slane %v754_v56, %v761_v27  ;;  %v778_v0 = vrot.slane %v740_v57, %v761_v27 }
  0xe8   :  { %v631_v4 = vpop.f32.mrf.mxu0  ;;  %v704_v5 = vpop.f32.mrf.mxu1 }
  0xe9   :  { %v3479_v6 = vadd.f32 %v2775_v1, %v631_v4  ;;  %v3481_v7 = vadd.f32 %v2776_v3, %v704_v5 }
  0xea   :  { %v2982_v8 = vpop.f32.mrf.mxu0  ;;  %v2993_v9 = vpop.f32.mrf.mxu1 }
  0xeb   :  { %1340 = vrot.lane.b32.xlu1 %v3481_v7, %s3202_s14  ;;  %1263 = vrot.lane.b32.xlu0 %v3479_v6, %s3202_s14 }
 0x13e   :  { %v801_v10 = vpop.permute.xlu0 %800 }
 0x13f   :  { %2995 = vmatpush3.xpose.msk.msra.mxu0 %vm802_vm2, %v801_v10 }
 0x140   :  { %3004 = vmatprep.subr.mxu0 %v3200_v2 }
 0x142   :  { %2997 = vmatmul.mubr.msk.f32.vlgmr.msra.gmra.mxu0 %vm802_vm2, %v3437_v44  ;;  %v879_v11 = vpop.permute.xlu0 %878 }
 0x143   :  { %3000 = vmatpush3.xpose.msk.msra.mxu1 %vm802_vm2, %v879_v11  ;;  %3006 = vmatprep.mubr.msk.f32.mxu0 %vm3201_vm1, %v3200_v2 }
 0x144   :  { %3009 = vmatprep.subr.mxu1 %v3200_v2 }
 0x146   :  { %3002 = vmatmul.mubr.msk.f32.vlgmr.msra.gmra.mxu1 %vm802_vm2, %v3439_v47 }
 0x147   :  { %3011 = vmatprep.mubr.msk.f32.mxu1 %vm3201_vm1, %v3200_v2 }
 0x148   :  { %v956_v12 = vpop.permute.xlu1 %955 }
 0x149   :  { %3005 = vmatpush3.xpose.msk.msra.mxu0 %vm802_vm2, %v956_v12  ;;  %v756_v12 = vcombine.high %v740_v57, %v740_v57 }
 0x14a   :  { %3014 = vmatprep.subr.mxu0 %v3200_v2 }
 0x14c   :  { %3007 = vmatmul.mubr.msk.f32.vlgmr.msra.gmra.mxu0 %vm802_vm2, %v3451_v52  ;;  %v1033_v13 = vpop.permute.xlu1 %1032 }
 0x14d   :  { %3010 = vmatpush3.xpose.msk.msra.mxu1 %vm802_vm2, %v1033_v13  ;;  %3016 = vmatprep.mubr.msk.f32.mxu0 %vm3201_vm1, %v3200_v2  ;;  %v758_v13 = vcombine.high %v754_v56, %v754_v56 }
 0x14e   :  { %3019 = vmatprep.subr.mxu1 %v3200_v2 }
 0x150   :  { %3012 = vmatmul.mubr.msk.f32.vlgmr.msra.gmra.mxu1 %vm802_vm2, %v3453_v55 }
 0x151   :  { %3021 = vmatprep.mubr.msk.f32.mxu1 %vm3201_vm1, %v3200_v2 }
 0x153   :  { %v1187_v14 = vpop.permute.xlu1 %1186  ;;  %v1110_v15 = vpop.permute.xlu0 %1109 }
 0x154   :  { %3015 = vmatpush3.xpose.msk.msra.mxu0 %vm802_vm2, %v1110_v15  ;;  %3020 = vmatpush3.xpose.msk.msra.mxu1 %vm802_vm2, %v1187_v14  ;;  %v786_v14 = vrot.slane %v756_v12, %v761_v27  ;;  %v790_v15 = vrot.slane %v758_v13, %v761_v27 }
 0x155   :  { %3029 = vmatprep.subr.mxu1 %v3200_v2  ;;  %3024 = vmatprep.subr.mxu0 %v3200_v2 }
 0x157   :  { %3017 = vmatmul.mubr.msk.f32.vlgmr.msra.gmra.mxu0 %vm802_vm2, %v3465_v61  ;;  %3022 = vmatmul.mubr.msk.f32.vlgmr.msra.gmra.mxu1 %vm802_vm2, %v3467_v62 }
 0x158   :  { %3026 = vmatprep.mubr.msk.f32.mxu0 %vm3201_vm1, %v3200_v2  ;;  %3031 = vmatprep.mubr.msk.f32.mxu1 %vm3201_vm1, %v3200_v2 }
 0x15d   :  { %v1341_v16 = vpop.permute.xlu1 %1340  ;;  %v1264_v17 = vpop.permute.xlu0 %1263 }
 0x15e   :  { %3025 = vmatpush3.xpose.msk.msra.mxu0 %vm802_vm2, %v1264_v17  ;;  %3030 = vmatpush3.xpose.msk.msra.mxu1 %vm802_vm2, %v1341_v16 }
 0x15f   :  { %3034 = vmatprep.subr.mxu0 %v3200_v2  ;;  %3039 = vmatprep.subr.mxu1 %v3200_v2 }
 0x161   :  { %3027 = vmatmul.mubr.msk.f32.vlgmr.msra.gmra.mxu0 %vm802_vm2, %v3479_v6  ;;  %3032 = vmatmul.mubr.msk.f32.vlgmr.msra.gmra.mxu1 %vm802_vm2, %v3481_v7 }
 0x162   :  { %3036 = vmatprep.mubr.msk.f32.mxu0 %vm3201_vm1, %v3200_v2  ;;  %3041 = vmatprep.mubr.msk.f32.mxu1 %vm3201_vm1, %v3200_v2 }
 0x202   :  { %v873_v31 = vpop.f32.mrf.mxu0 }
 0x203   :  { %v3538_v32 = vadd.f32 %v873_v31, %v762_v29 }
 0x204   :  { %v2998_v35 = vpop.f32.mrf.mxu0 }
 0x205   :  { %v1416_v36 = vsel %vm802_vm2, %v3538_v32, -inf }
 0x206   :  { %v950_v38 = vpop.f32.mrf.mxu1  ;;  %1417 = vmax.xlane.f32.xlu0 %v1416_v36 }
 0x207   :  { %v951_v39 = vadd.f32 %v950_v38, %v766_v33 }
 0x208   :  { %v3003_v40 = vpop.f32.mrf.mxu1 }
 0x209   :  { %v1419_v42 = vsel %vm802_vm2, %v951_v39, -inf }
 0x20a   :  { %1420 = vmax.xlane.f32.xlu1 %v1419_v42 }
 0x20c   :  { %v1027_v46 = vpop.f32.mrf.mxu0 }
 0x20d   :  { %v1028_v49 = vadd.f32 %v1027_v46, %v770_v43 }
 0x20e   :  { %v3008_v51 = vpop.f32.mrf.mxu0 }
 0x20f   :  { %v1422_v53 = vsel %vm802_vm2, %v1028_v49, -inf }
 0x210   :  { %v1104_v54 = vpop.f32.mrf.mxu1  ;;  %1423 = vmax.xlane.f32.xlu0 %v1422_v53 }
 0x211   :  { %v1105_v58 = vadd.f32 %v1104_v54, %v774_v50 }
 0x212   :  { %v3013_v59 = vpop.f32.mrf.mxu1 }
 0x213   :  { %v1425_v60 = vsel %vm802_vm2, %v1105_v58, -inf }
 0x214   :  { %1426 = vmax.xlane.f32.xlu0 %v1425_v60 }
 0x217   :  { %v1258_v1 = vpop.f32.mrf.mxu1  ;;  %v1181_v3 = vpop.f32.mrf.mxu0 }
 0x218   :  { %v1259_v4 = vadd.f32 %v1258_v1, %v782_v63  ;;  %v1182_v5 = vadd.f32 %v1181_v3, %v778_v0 }
 0x219   :  { %v3018_v8 = vpop.f32.mrf.mxu0  ;;  %v3023_v9 = vpop.f32.mrf.mxu1 }
 0x21a   :  { %v1431_v10 = vsel %vm802_vm2, %v1259_v4, -inf  ;;  %v1428_v11 = vsel %vm802_vm2, %v1182_v5, -inf }
 0x21b   :  { %1432 = vmax.xlane.f32.xlu0 %v1431_v10  ;;  %1429 = vmax.xlane.f32.xlu1 %v1428_v11 }
 0x221   :  { %v1335_v16 = vpop.f32.mrf.mxu0  ;;  %v1412_v17 = vpop.f32.mrf.mxu1 }
 0x222   :  { %v1336_v18 = vadd.f32 %v1335_v16, %v786_v14  ;;  %v1413_v19 = vadd.f32 %v1412_v17, %v790_v15 }
 0x223   :  { %v3028_v20 = vpop.f32.mrf.mxu0  ;;  %v3033_v21 = vpop.f32.mrf.mxu1 }
 0x224   :  { %v1437_v22 = vsel %vm802_vm2, %v1413_v19, -inf  ;;  %v1434_v23 = vsel %vm802_vm2, %v1336_v18, -inf }
 0x225   :  { %1438 = vmax.xlane.f32.xlu0 %v1437_v22  ;;  %1435 = vmax.xlane.f32.xlu1 %v1434_v23 }
 0x236   :  { %1512 = vrot.lane.b32.xlu1 %v3437_v44, %s3204_s5 }
 0x23a   :  { %1664 = vrot.lane.b32.xlu1 %v3451_v52, %s3204_s5 }
 0x23b   :  { %1588 = vrot.lane.b32.xlu0 %v3439_v47, %s3204_s5 }
 0x23e   :  { %1740 = vrot.lane.b32.xlu1 %v3453_v55, %s3204_s5 }
 0x23f   :  { %1816 = vrot.lane.b32.xlu0 %v3465_v61, %s3204_s5 }
 0x242   :  { %1892 = vrot.lane.b32.xlu1 %v3467_v62, %s3204_s5 }
 0x28f   :  { %v1418_v24 = vpop.xlane.xlu0 %1417 }
 0x290   :  { %v1440_v25 = vsub.f32 %v3538_v32, %v1418_v24 }
 0x292   :  { %v1448_v26 = vmul.f32 1.442695, %v1440_v25 }
 0x293   :  { %v1421_v44 = vpop.xlane.xlu1 %1420 }
 0x294   :  { %3124 = vpow2.f32 %v1448_v26  ;;  %v1441_v27 = vsub.f32 %v951_v39, %v1421_v44 }
 0x296   :  { %v1450_v52 = vmul.f32 1.442695, %v1441_v27 }
 0x298   :  { %3126 = vpow2.f32 %v1450_v52 }
 0x299   :  { %v1424_v28 = vpop.xlane.xlu0 %1423 }
 0x29a   :  { %v1442_v47 = vsub.f32 %v1028_v49, %v1424_v28 }
 0x29c   :  { %v1452_v29 = vmul.f32 1.442695, %v1442_v47 }
 0x29d   :  { %v1427_v30 = vpop.xlane.xlu0 %1426 }
 0x29e   :  { %3128 = vpow2.f32 %v1452_v29  ;;  %v1443_v55 = vsub.f32 %v1105_v58, %v1427_v30  ;;  %v2120_v30 = vld [vmem:[%s3716_s3] sm:$0xff] }
 0x2a0   :  { %v1454_v31 = vmul.f32 1.442695, %v1443_v55  ;;  %v2121_v55 = vld [vmem:[%s3716_s3 + $0x8] sm:$0xff] }
 0x2a1   :  { %v3125_v61 = vpop.eup %3124 }
 0x2a2   :  { %3130 = vpow2.f32 %v1454_v31  ;;  %v1464_v62 = vsel %vm802_vm2, %v3125_v61, 0.0  ;;  %v2122_v31 = vld [vmem:[%s3716_s3 + $0x10] sm:$0xff] }
 0x2a3   :  { %1465 = vadd.xlane.f32.xlu1 %v1464_v62 }
 0x2a4   :  { %v1433_v33 = vpop.xlane.xlu0 %1432  ;;  %v1430_v32 = vpop.xlane.xlu1 %1429 }
 0x2a5   :  { %v3127_v34 = vpop.eup %3126  ;;  %v1445_v35 = vsub.f32 %v1259_v4, %v1433_v33  ;;  %v1444_v36 = vsub.f32 %v1182_v5, %v1430_v32  ;;  %v2123_v33 = vld [vmem:[%s3716_s3 + $0x18] sm:$0xff] }
 0x2a6   :  { %v1467_v37 = vsel %vm802_vm2, %v3127_v34, 0.0 }
 0x2a7   :  { %v1458_v38 = vmul.f32 1.442695, %v1445_v35  ;;  %v1456_v39 = vmul.f32 1.442695, %v1444_v36  ;;  %1468 = vadd.xlane.f32.xlu0 %v1467_v37  ;;  %v2124_v35 = vld [vmem:[%s3716_s3 + $0x20] sm:$0xff] }
 0x2a9   :  { %3132 = vpow2.f32 %v1458_v38  ;;  %v2125_v38 = vld [vmem:[%s3716_s3 + $0x28] sm:$0xff] }
 0x2aa   :  { %3134 = vpow2.f32 %v1456_v39 }
 0x2ab   :  { %v3564_v40 = vpop.eup %3128 }
 0x2ac   :  { %v1470_v41 = vsel %vm802_vm2, %v3564_v40, 0.0 }
 0x2ad   :  { %1471 = vadd.xlane.f32.xlu1 %v1470_v41  ;;  %v2127_v41 = vld [vmem:[%s3716_s3 + $0x38] sm:$0xff] }
 0x2ae   :  { %v1439_v42 = vpop.xlane.xlu0 %1438  ;;  %v1436_v43 = vpop.xlane.xlu1 %1435 }
 0x2af   :  { %v3568_v45 = vpop.eup %3130  ;;  %v1447_v46 = vsub.f32 %v1413_v19, %v1439_v42  ;;  %v1446_v48 = vsub.f32 %v1336_v18, %v1436_v43  ;;  %v2126_v43 = vld [vmem:[%s3716_s3 + $0x30] sm:$0xff]  ;;  %s3205_s3 = smov [#allocation4]  }
 0x2b0   :  { %v1473_v49 = vsel %vm802_vm2, %v3568_v45, 0.0  ;;  %s2754_s19 = sshll.u32 %s3205_s3, 4  ;;  %s2755_s19 = int_to_ptr.vmem [resolvable:$true] %s2754_s19 }
 0x2b1   :  { %v1462_v50 = vmul.f32 1.442695, %v1447_v46  ;;  %v1460_v51 = vmul.f32 1.442695, %v1446_v48  ;;  %1474 = vadd.xlane.f32.xlu0 %v1473_v49  ;;  %s3156_s20 = scalar_lea.vmem %s2755_s19, 1024  ;;  %p3161_p1 = scmp.lt.s32.totalorder %s2755_s19, %s2755_s19 }
 0x2b2   :  { %v1589_v53 = vpop.permute.xlu0 %1588  ;;  %v1513_v54 = vpop.permute.xlu1 %1512  ;;  %p3157_p0 = scmp.ne.s32.totalorder %s2755_s19, %s3156_s20  ;;  %p3162_p2 = scmp.lt.s32.totalorder %s3156_s20, %s3156_s20 }
 0x2b3   :  { %3136 = vpow2.f32 %v1462_v50  ;;  %3035 = vmatpush3.msra.mxu0 %v1513_v54  ;;  %3040 = vmatpush3.msra.mxu1 %v1589_v53 }
 0x2b4   :  { %3138 = vpow2.f32 %v1460_v51  ;;  %3044 = vmatprep.subr.mxu0 %v3200_v2  ;;  %3049 = vmatprep.subr.mxu1 %v3200_v2  ;;  %p3163_p3 = por %p3162_p2, %p3161_p1 }
 0x2b6   :  { %v3574_v56 = vpop.eup %3132  ;;  %v1665_v3 = vpop.permute.xlu1 %1664  ;;  %p3164_p4 = pnand %p3163_p3, %p3157_p0 }
 0x2b7   :  { %v3576_v57 = vpop.eup %3134  ;;  %v1479_v58 = vsel %vm802_vm2, %v3574_v56, 0.0  ;;  %v1817_v8 = vpop.permute.xlu0 %1816 }
 0x2b8   :  { %1480 = vadd.xlane.f32.xlu0 %v1479_v58  ;;  %v1476_v59 = vsel %vm802_vm2, %v3576_v57, 0.0 }
 0x2b9   :  { %1477 = vadd.xlane.f32.xlu1 %v1476_v59 }
 0x2ba   :  { %v1741_v4 = vpop.permute.xlu1 %1740 }
 0x2be   :  { %v1893_v5 = vpop.permute.xlu1 %1892 }
 0x2c0   :  { %v3582_v60 = vpop.eup %3136 }
 0x2c1   :  { %v3584_v63 = vpop.eup %3138  ;;  %v1485_v0 = vsel %vm802_vm2, %v3582_v60, 0.0 }
 0x2c2   :  { %1486 = vadd.xlane.f32.xlu0 %v1485_v0  ;;  %v1482_v1 = vsel %vm802_vm2, %v3584_v63, 0.0 }
 0x2c3   :  { %1483 = vadd.xlane.f32.xlu1 %v1482_v1 }
 0x2d4   :  { %2044 = vrot.lane.b32.xlu1 %v3481_v7, %s3204_s5 }
 0x2d8   :  { %1968 = vrot.lane.b32.xlu0 %v3479_v6, %s3204_s5 }
 0x32c   :  { %v1466_v9 = vpop.xlane.xlu1 %1465 }
 0x32d   :  { %3140 = vrcp.f32 %v1466_v9 }
 0x330   :  { %v1469_v10 = vpop.xlane.xlu0 %1468 }
 0x331   :  { %3142 = vrcp.f32 %v1469_v10 }
 0x336   :  { %v1472_v11 = vpop.xlane.xlu1 %1471 }
 0x337   :  { %3144 = vrcp.f32 %v1472_v11 }
 0x33a   :  { %v3141_v12 = vpop.eup %3140  ;;  %v1475_v13 = vpop.xlane.xlu0 %1474 }
 0x33b   :  { %3146 = vrcp.f32 %v1475_v13  ;;  %v1489_v14 = vmul.f32 %v3141_v12, %v3125_v61 }
 0x33d   :  { %1504 = vst.msk [vmem:[#allocation4] sm:$0xff] %vm802_vm2, %v1489_v14  ;;  %3037 = vmatmul.mubr.msk.f32.vlgmr.msra.gmra.mxu0 %vm802_vm2, %v1489_v14 }
 0x33e   :  { %v3143_v7 = vpop.eup %3142  ;;  %3045 = vmatpush3.msra.mxu0 %v1665_v3  ;;  %3046 = vmatprep.mubr.msk.f32.mxu0 %vm3201_vm1, %v3200_v2 }
 0x33f   :  { %v1491_v6 = vmul.f32 %v3143_v7, %v3127_v34  ;;  %3054 = vmatprep.subr.mxu0 %v3200_v2 }
 0x341   :  { %v1481_v15 = vpop.xlane.xlu0 %1480  ;;  %1505 = vst.msk [vmem:[#allocation4 + $0x8] sm:$0xff] %vm802_vm2, %v1491_v6  ;;  %3042 = vmatmul.mubr.msk.f32.vlgmr.msra.gmra.mxu1 %vm802_vm2, %v1491_v6 }
 0x342   :  { %3148 = vrcp.f32 %v1481_v15  ;;  %v1478_v16 = vpop.xlane.xlu1 %1477  ;;  %3050 = vmatpush3.msra.mxu1 %v1741_v4  ;;  %3051 = vmatprep.mubr.msk.f32.mxu1 %vm3201_vm1, %v3200_v2 }
 0x343   :  { %3150 = vrcp.f32 %v1478_v16  ;;  %3059 = vmatprep.subr.mxu1 %v3200_v2 }
 0x344   :  { %v3145_v17 = vpop.eup %3144 }
 0x345   :  { %v1493_v18 = vmul.f32 %v3145_v17, %v3564_v40 }
 0x347   :  { %1506 = vst.msk [vmem:[#allocation4 + $0x10] sm:$0xff] %vm802_vm2, %v1493_v18  ;;  %3047 = vmatmul.mubr.msk.f32.vlgmr.msra.gmra.mxu0 %vm802_vm2, %v1493_v18 }
 0x348   :  { %v3147_v19 = vpop.eup %3146  ;;  %3055 = vmatpush3.msra.mxu0 %v1817_v8  ;;  %3056 = vmatprep.mubr.msk.f32.mxu0 %vm3201_vm1, %v3200_v2 }
 0x349   :  { %v1495_v20 = vmul.f32 %v3147_v19, %v3568_v45  ;;  %3064 = vmatprep.subr.mxu0 %v3200_v2 }
 0x34b   :  { %v1487_v21 = vpop.xlane.xlu0 %1486  ;;  %1507 = vst.msk [vmem:[#allocation4 + $0x18] sm:$0xff] %vm802_vm2, %v1495_v20  ;;  %3052 = vmatmul.mubr.msk.f32.vlgmr.msra.gmra.mxu1 %vm802_vm2, %v1495_v20 }
 0x34c   :  { %3152 = vrcp.f32 %v1487_v21  ;;  %v1484_v22 = vpop.xlane.xlu1 %1483  ;;  %3060 = vmatpush3.msra.mxu1 %v1893_v5  ;;  %3061 = vmatprep.mubr.msk.f32.mxu1 %vm3201_vm1, %v3200_v2 }
 0x34d   :  { %3154 = vrcp.f32 %v1484_v22  ;;  %3069 = vmatprep.subr.mxu1 %v3200_v2 }
 0x34f   :  { %v3149_v23 = vpop.eup %3148  ;;  %v1969_v27 = vpop.permute.xlu0 %1968 }
 0x350   :  { %v3151_v24 = vpop.eup %3150  ;;  %v1499_v25 = vmul.f32 %v3149_v23, %v3574_v56  ;;  %v2045_v44 = vpop.permute.xlu1 %2044 }
 0x351   :  { %v1497_v26 = vmul.f32 %v3151_v24, %v3576_v57 }
 0x352   :  { %1509 = vst.msk [vmem:[#allocation4 + $0x28] sm:$0xff] %vm802_vm2, %v1499_v25  ;;  %3062 = vmatmul.mubr.msk.f32.vlgmr.msra.gmra.mxu1 %vm802_vm2, %v1499_v25 }
 0x353   :  { %1508 = vst.msk [vmem:[#allocation4 + $0x20] sm:$0xff] %vm802_vm2, %v1497_v26  ;;  %3057 = vmatmul.mubr.msk.f32.vlgmr.msra.gmra.mxu0 %vm802_vm2, %v1497_v26  ;;  %3070 = vmatpush3.msra.mxu1 %v2045_v44 }
 0x354   :  { %3065 = vmatpush3.msra.mxu0 %v1969_v27  ;;  %3066 = vmatprep.mubr.msk.f32.mxu0 %vm3201_vm1, %v3200_v2 }
 0x355   :  { %3071 = vmatprep.mubr.msk.f32.mxu1 %vm3201_vm1, %v3200_v2  ;;  %3074 = vmatprep.subr.mxu0 %v3200_v2 }
 0x356   :  { %3079 = vmatprep.subr.mxu1 %v3200_v2 }
 0x359   :  { %v3153_v52 = vpop.eup %3152 }
 0x35a   :  { %v3155_v28 = vpop.eup %3154  ;;  %v1503_v47 = vmul.f32 %v3153_v52, %v3582_v60 }
 0x35b   :  { %v1501_v29 = vmul.f32 %v3155_v28, %v3584_v63 }
 0x35c   :  { %1511 = vst.msk [vmem:[#allocation4 + $0x38] sm:$0xff] %vm802_vm2, %v1503_v47  ;;  %3072 = vmatmul.mubr.msk.f32.vlgmr.msra.gmra.mxu1 %vm802_vm2, %v1503_v47 }
 0x35d   :  { %1510 = vst.msk [vmem:[#allocation4 + $0x30] sm:$0xff] %vm802_vm2, %v1501_v29  ;;  %3067 = vmatmul.mubr.msk.f32.vlgmr.msra.gmra.mxu0 %vm802_vm2, %v1501_v29  ;;  %3081 = vmatprep.mubr.msk.f32.mxu1 %vm3201_vm1, %v3200_v2 }
 0x35e   :  { %3076 = vmatprep.mubr.msk.f32.mxu0 %vm3201_vm1, %v3200_v2  ;;  %3075 = vmatpush3.msra.mxu0 %v2120_v30 }
 0x35f   :  { %3084 = vmatprep.subr.mxu0 %v3200_v2  ;;  %3080 = vmatpush3.msra.mxu1 %v2121_v55 }
 0x360   :  { %3089 = vmatprep.subr.mxu1 %v3200_v2 }
 0x3fd   :  { %v1584_v61 = vpop.f32.mrf.mxu0 }
 0x3fe   :  { %3077 = vmatmul.mubr.msk.f32.vlgmr.msra.gmra.mxu0 %vm802_vm2, %v1584_v61 }
 0x3ff   :  { %v3038_v62 = vpop.f32.mrf.mxu0  ;;  %3085 = vmatpush3.msra.mxu0 %v2122_v31  ;;  %3086 = vmatprep.mubr.msk.f32.mxu0 %vm3201_vm1, %v3200_v2 }
 0x400   :  { %3094 = vmatprep.subr.mxu0 %v3200_v2 }
 0x401   :  { %v1660_v32 = vpop.f32.mrf.mxu1 }
 0x402   :  { %3082 = vmatmul.mubr.msk.f32.vlgmr.msra.gmra.mxu1 %vm802_vm2, %v1660_v32 }
 0x403   :  { %v3043_v34 = vpop.f32.mrf.mxu1  ;;  %3090 = vmatpush3.msra.mxu1 %v2123_v33  ;;  %3091 = vmatprep.mubr.msk.f32.mxu1 %vm3201_vm1, %v3200_v2 }
 0x404   :  { %3099 = vmatprep.subr.mxu1 %v3200_v2 }
 0x407   :  { %v1736_v36 = vpop.f32.mrf.mxu0 }
 0x408   :  { %3087 = vmatmul.mubr.msk.f32.vlgmr.msra.gmra.mxu0 %vm802_vm2, %v1736_v36 }
 0x409   :  { %v3048_v37 = vpop.f32.mrf.mxu0  ;;  %3095 = vmatpush3.msra.mxu0 %v2124_v35  ;;  %3096 = vmatprep.mubr.msk.f32.mxu0 %vm3201_vm1, %v3200_v2 }
 0x40a   :  { %3104 = vmatprep.subr.mxu0 %v3200_v2 }
 0x40b   :  { %v1812_v39 = vpop.f32.mrf.mxu1 }
 0x40c   :  { %3092 = vmatmul.mubr.msk.f32.vlgmr.msra.gmra.mxu1 %vm802_vm2, %v1812_v39 }
 0x40d   :  { %v3053_v40 = vpop.f32.mrf.mxu1  ;;  %3100 = vmatpush3.msra.mxu1 %v2125_v38  ;;  %3101 = vmatprep.mubr.msk.f32.mxu1 %vm3201_vm1, %v3200_v2 }
 0x40e   :  { %3109 = vmatprep.subr.mxu1 %v3200_v2 }
 0x412   :  { %v1964_v42 = vpop.f32.mrf.mxu1 }
 0x413   :  { %v1888_v45 = vpop.f32.mrf.mxu0  ;;  %3102 = vmatmul.mubr.msk.f32.vlgmr.msra.gmra.mxu1 %vm802_vm2, %v1964_v42 }
 0x414   :  { %3097 = vmatmul.mubr.msk.f32.vlgmr.msra.gmra.mxu0 %vm802_vm2, %v1888_v45  ;;  %v3063_v46 = vpop.f32.mrf.mxu1  ;;  %3110 = vmatpush3.msra.mxu1 %v2127_v41 }
 0x415   :  { %v3058_v48 = vpop.f32.mrf.mxu0  ;;  %3105 = vmatpush3.msra.mxu0 %v2126_v43  ;;  %3106 = vmatprep.mubr.msk.f32.mxu0 %vm3201_vm1, %v3200_v2 }
 0x416   :  { %3111 = vmatprep.mubr.msk.f32.mxu1 %vm3201_vm1, %v3200_v2 }
 0x41c   :  { %v2116_v49 = vpop.f32.mrf.mxu1 }
 0x41d   :  { %v2040_v50 = vpop.f32.mrf.mxu0  ;;  %3112 = vmatmul.mubr.msk.f32.vlgmr.msra.gmra.mxu1 %vm802_vm2, %v2116_v49 }
 0x41e   :  { %3107 = vmatmul.mubr.msk.f32.vlgmr.msra.gmra.mxu0 %vm802_vm2, %v2040_v50  ;;  %v3073_v51 = vpop.f32.mrf.mxu1 }
 0x41f   :  { %v3068_v53 = vpop.f32.mrf.mxu0 }
 0x420   :  { %3167 = shalt.err (!%p3164_p4)
}
 0x421   :  { %s3206_s21 = smov 128   ;;  %s3207_s22 = smov 8   ;;  %v2817_v8 = vld [vmem:[%s3717_s4] ss:$0 sm:$0xff] }
 0x422   :  { %2760 = dma.vmem_to_hbm [thread:$0]  %s2755_s19, 1024, %s3720_s7, [#allocation5], %s3206_s21, %s3206_s21, %s3207_s22  }
 0x423   :  { %s3208_s4 = smov [#allocation2]  }
 0x424   :  { %s2742_s7 = sshll.u32 %s3208_s4, 4  ;;  %s2743_s7 = int_to_ptr.vmem [resolvable:$true] %s2742_s7 }
 0x425   :  { %s3176_s2 = scalar_lea.vmem %s2743_s7, 256  ;;  %p3181_p6 = scmp.lt.s32.totalorder %s2743_s7, %s2743_s7 }
 0x426   :  { %p3177_p5 = scmp.ne.s32.totalorder %s2743_s7, %s3176_s2  ;;  %p3182_p7 = scmp.lt.s32.totalorder %s3176_s2, %s3176_s2 }
 0x428   :  { %p3183_p8 = por %p3182_p7, %p3181_p6 }
 0x42a   :  { %p3184_p9 = pnand %p3183_p8, %p3177_p5 }
 0x4be   :  { %v2197_v2 = vpop.f32.mrf.mxu0 }
 0x4bf   :  { %v2712_v60 = vsel %vm123_vm0, %v2197_v2, 0.0 }
 0x4c0   :  { %v3078_v54 = vpop.f32.mrf.mxu0 }
 0x4c2   :  { %v2270_v56 = vpop.f32.mrf.mxu1 }
 0x4c3   :  { %v2713_v58 = vsel %vm123_vm0, %v2270_v56, 0.0 }
 0x4c4   :  { %v3083_v57 = vpop.f32.mrf.mxu1  ;;  %v2714_v0 = vadd.f32 %v2713_v58, %v2712_v60 }
 0x4c8   :  { %v2343_v59 = vpop.f32.mrf.mxu0 }
 0x4c9   :  { %v2715_v63 = vsel %vm123_vm0, %v2343_v59, 0.0 }
 0x4ca   :  { %v3088_v1 = vpop.f32.mrf.mxu0  ;;  %v2716_v3 = vadd.f32 %v2715_v63, %v2714_v0 }
 0x4cc   :  { %v2416_v4 = vpop.f32.mrf.mxu1 }
 0x4cd   :  { %v2717_v5 = vsel %vm123_vm0, %v2416_v4, 0.0 }
 0x4ce   :  { %v2718_v9 = vadd.f32 %v2717_v5, %v2716_v3  ;;  %v3093_v10 = vpop.f32.mrf.mxu1 }
 0x4d0   :  { %v2733_v11 = vadd.f32 %v2817_v8, %v2718_v9 }
 0x4d2   :  { %2735 = vst.msk [vmem:[#allocation2] sm:$0xff] %vm123_vm0, %v2733_v11 }
 0x4d3   :  { %v2562_v12 = vpop.f32.mrf.mxu1 }
 0x4d4   :  { %v2489_v13 = vpop.f32.mrf.mxu0  ;;  %v2720_v15 = vsel %vm123_vm0, %v2562_v12, 0.0 }
 0x4d5   :  { %v3103_v14 = vpop.f32.mrf.mxu1  ;;  %v2719_v6 = vsel %vm123_vm0, %v2489_v13, 0.0 }
 0x4d6   :  { %v3098_v7 = vpop.f32.mrf.mxu0  ;;  %v2721_v17 = vadd.f32 %v2720_v15, %v2719_v6 }
 0x4dd   :  { %v2708_v16 = vpop.f32.mrf.mxu1 }
 0x4de   :  { %v2635_v18 = vpop.f32.mrf.mxu0  ;;  %v2724_v23 = vsel %vm123_vm0, %v2708_v16, 0.0 }
 0x4df   :  { %v2722_v19 = vsel %vm123_vm0, %v2635_v18, 0.0  ;;  %v3113_v20 = vpop.f32.mrf.mxu1 }
 0x4e0   :  { %v2723_v21 = vadd.f32 %v2722_v19, %v2721_v17  ;;  %v3108_v22 = vpop.f32.mrf.mxu0 }
 0x4e2   :  { %v2725_v24 = vadd.f32 %v2724_v23, %v2723_v21 }
 0x4e4   :  { %v2734_v25 = vadd.f32 %v2817_v8, %v2725_v24 }
 0x4e6   :  { %2736 = vst.msk [vmem:[#allocation2 + $0x8] sm:$0xff] %vm123_vm0, %v2734_v25 }
 0x4e7   :  { %3187 = shalt.err (!%p3184_p9)
}
 0x4e8   :  { %2748 = dma.vmem_to_hbm [thread:$0]  %s2743_s7, 256, %s3719_s6, [#allocation3], %s3206_s21, %s3206_s21, %s3207_s22  }
 0x4e9   :  { %3196 = dma.done.wait [#allocation3], 256  }
 0x4ea   :  { %3197 = vsyncadd [#allocation3], 4294967040 }
 0x4eb   :  { %3198 = dma.done.wait [#allocation5], 1024  }
 0x4ec   :  { %3199 = vsyncadd [#allocation5], 4294966272 }
 0x4ed   :  { %2767 = vsyncpa [#allocation3], 1 }
 0x4ee   :  { %2768 = vsyncpa [#allocation5], 1 }

</bundles_post_ra>
